<compile_context>
chip_gen: v7x
topology: tpu7x:2x2x1
jax: 0.10.0
libtpu: 0.0.40
codegen_flags: <defaults>
</compile_context>

<pallas_src>
import math

import jax
import jax.numpy as jnp
from jax.experimental import pallas as pl
from jax.experimental.pallas import tpu as pltpu


def _round_up(n, m):
    return ((n + m - 1) // m) * m


def _make_kernel(num_modalities, feat_dim, exact_softmax):
    """Build the kernel for a fixed number of modalities.

    Ref layout (in order):
      x_0 .. x_{M-1} : (tile, D_i)   flattened (batch*seq) rows per modality
      w_0 .. w_{M-1} : (D_i, 2F)     folded weights [Wp_i | Wp_i @ Ww]
      b              : (1, 2F)       folded bias    [bp   | bp @ Ww + bw]
      o              : (tile, F)
    """
    F = feat_dim

    def kernel(*refs):
        x_refs = refs[:num_modalities]
        w_refs = refs[num_modalities:2 * num_modalities]
        b_ref = refs[2 * num_modalities]
        o_ref = refs[2 * num_modalities + 1]

        # One wide (tile, D_i) x (D_i, 2F) MXU matmul per modality, f32 accum.
        y = jnp.dot(x_refs[0][...], w_refs[0][...],
                    preferred_element_type=jnp.float32)
        for xr, wr in zip(x_refs[1:], w_refs[1:]):
            y = y + jnp.dot(xr[...], wr[...],
                            preferred_element_type=jnp.float32)
        y = y + b_ref[...]

        # Slice the fused result: first F columns = cat(proj), last F = logits.
        # (F is a multiple of 128 in well-shaped configs -> tile-aligned slices.)
        proj = y[:, :F]
        logits = y[:, F:]

        # Row-wise softmax over the feature axis (max-subtracted), all f32.
        mx = jnp.max(logits, axis=-1, keepdims=True)
        e = jnp.exp(logits - mx)
        s = jnp.sum(e, axis=-1, keepdims=True)
        if exact_softmax:
            attn = e / s
        else:
            # EUP approximate reciprocal: ~2^-12 relative error, free slot.
            attn = e * pl.reciprocal(s, approx=True)

        o_ref[...] = (attn * proj).astype(o_ref.dtype)

    return kernel


def attention_fusion(x, ws, bs, ww, bw, *, row_tile=1024,
                     compute_dtype=jnp.float32, out_dtype=jnp.float32,
                     exact_softmax=False):
    """AttentionFusion forward.

    x  : dict (or list) of per-modality arrays shaped (BS, D_i, S)
    ws : list of per-modality Linear weights, each (D_i, F0)
    bs : list of per-modality Linear biases, each (F0,)
    ww : (F, F) attention-weight Linear weight,  bw : (F,) its bias
    Returns (BS, S, F) with F = F0 * num_modalities.
    """
    xs = list(x.values()) if isinstance(x, dict) else list(x)
    M = len(xs)
    BS, _, S = xs[0].shape
    dims = [int(m.shape[1]) for m in xs]
    F0 = int(ws[0].shape[1])
    F = F0 * M
    assert ww.shape == (F, F)

    # ---- Fold the two chained Linears into one weight/bias per modality ----
    #   proj   = sum_i x_i @ Wp_i + bp                  (Wp_i block-diagonal)
    #   logits = proj @ Ww + bw = sum_i x_i @ (Wp_i @ Ww) + (bp @ Ww + bw)
    # so each modality ships one (D_i, 2F) matrix [Wp_i | Wp_i @ Ww].
    w_comb = []
    col = 0
    for w in ws:
        d = int(w.shape[0])
        w32 = w.astype(jnp.float32)
        wp_i = jnp.zeros((d, F), jnp.float32).at[:, col:col + F0].set(w32)
        wl_i = w32 @ ww.astype(jnp.float32)[col:col + F0, :]   # == Wp_i @ Ww
        w_comb.append(jnp.concatenate([wp_i, wl_i], axis=-1).astype(compute_dtype))
        col += F0
    bp = jnp.concatenate([b.astype(jnp.float32) for b in bs])          # (F,)
    bl = bp @ ww.astype(jnp.float32) + bw.astype(jnp.float32)          # (F,)
    b_comb = jnp.concatenate([bp, bl]).reshape(1, 2 * F)               # f32

    # ---- Flatten rows per modality (no wrapper-side concat / x_cat pass) ----
    N = BS * S
    xrows = [jnp.transpose(m, (0, 2, 1)).reshape(N, d).astype(compute_dtype)
             for m, d in zip(xs, dims)]

    # ---- Row tiling: big tiles, cdiv + tail padding, keep v7x cores busy ----
    assert row_tile % 8 == 0
    tile = min(row_tile, _round_up(N, 8))
    if N >= 1024 and tile >= N:
        # Don't let a huge row_tile collapse the grid to 1 step on large inputs;
        # v7x needs >= 2 "parallel" steps to use both TensorCores.
        tile = _round_up(pl.cdiv(N, 2), 8)
    n_tiles = pl.cdiv(N, tile)
    Np = n_tiles * tile
    if Np != N:   # zero-padded tail rows are benign and sliced off below
        xrows = [jnp.pad(xr, ((0, Np - N), (0, 0))) for xr in xrows]

    in_specs = [pl.BlockSpec((tile, d), lambda i: (i, 0)) for d in dims]
    # Weights/bias use a constant index_map (resident across the grid).
    # TODO(synk): optionally single-buffer these (pipeline_mode=pl.Buffered(1))
    # to shave a little VMEM on v7x; negligible at these weight sizes.
    in_specs += [pl.BlockSpec((d, 2 * F), lambda i: (0, 0)) for d in dims]
    in_specs.append(pl.BlockSpec((1, 2 * F), lambda i: (0, 0)))

    out = pl.pallas_call(
        _make_kernel(M, F, exact_softmax),
        out_shape=jax.ShapeDtypeStruct((Np, F), out_dtype),
        grid_spec=pltpu.PrefetchScalarGridSpec(
            num_scalar_prefetch=0,
            grid=(n_tiles,),
            in_specs=in_specs,
            out_specs=pl.BlockSpec((tile, F), lambda i: (i, 0)),
        ),
        compiler_params=pltpu.CompilerParams(
            dimension_semantics=("parallel",)),
    )(*xrows, *w_comb, b_comb)

    return out[:N].reshape(BS, S, F)


def _linear_init(key, fan_in, fan_out):
    """Deterministic PyTorch-style nn.Linear init (uniform +/- 1/sqrt(fan_in))."""
    kw, kb = jax.random.split(key)
    bound = 1.0 / math.sqrt(fan_in)
    w = jax.random.uniform(kw, (fan_in, fan_out), jnp.float32, -bound, bound)
    b = jax.random.uniform(kb, (fan_out,), jnp.float32, -bound, bound)
    return w, b


def _reference(xs, ws, bs, ww, bw):
    """Pure-JAX replica of the PyTorch forward (unfused, torch op order)."""
    proj = [jnp.einsum("bds,do->bso", m, w) + b for m, w, b in zip(xs, ws, bs)]
    cat = jnp.concatenate(proj, axis=-1)
    logits = cat @ ww + bw
    attn = jax.nn.softmax(logits, axis=-1)
    return attn * cat


if __name__ == "__main__":
    num_feats_modality = [40, 24]        # per-modality input feature counts
    num_out_feats = 64                   # F0; F = F0 * M = 128 (lane-dense output)
    BS, S = 2, 8
    M = len(num_feats_modality)
    F = num_out_feats * M

    key = jax.random.PRNGKey(0)
    k_x, k_w = jax.random.split(key)

    # Modality tensors: (BS, D_i, S), matching m.transpose(1, 2) in the module.
    xs = [jax.random.normal(jax.random.fold_in(k_x, i), (BS, d, S), jnp.float32)
          for i, d in enumerate(num_feats_modality)]
    x = {f"mod{i}": m for i, m in enumerate(xs)}

    ws, bs = [], []
    for i, d in enumerate(num_feats_modality):
        w, b = _linear_init(jax.random.fold_in(k_w, i), d, num_out_feats)
        ws.append(w)
        bs.append(b)
    ww, bw = _linear_init(jax.random.fold_in(k_w, 100), F, F)

    # Demo keeps f32 in/out for tight parity; on v6e/v7x pass
    # compute_dtype=jnp.bfloat16 (and optionally out_dtype=jnp.bfloat16).
    out = attention_fusion(x, ws, bs, ww, bw, row_tile=1024)
    out = jax.block_until_ready(out)

    ref = _reference(xs, ws, bs, ww, bw)
    # Tolerance covers the EUP approximate reciprocal and the folded-GEMM
    # (wp@ww) associativity difference; both are << 1e-3 here.
    if not jnp.allclose(out, ref, atol=1e-3, rtol=1e-3):
        err = float(jnp.max(jnp.abs(out - ref)))
        raise AssertionError(
            f"Pallas kernel output mismatch vs JAX reference (max abs err {err})")

    print("KERNEL_OK")
</pallas_src>

<mosaic_0001>
module attributes {stable_mosaic.version = 11 : i64} {
  func.func @kernel(%arg0: i32, %arg1: memref<16x40xf32, #tpu.memory_space<vmem>>, %arg2: memref<16x24xf32, #tpu.memory_space<vmem>>, %arg3: memref<40x256xf32, #tpu.memory_space<vmem>>, %arg4: memref<24x256xf32, #tpu.memory_space<vmem>>, %arg5: memref<1x256xf32, #tpu.memory_space<vmem>>, %arg6: memref<16x128xf32, #tpu.memory_space<vmem>>) attributes {dimension_semantics = [#tpu.dimension_semantics<parallel>], iteration_bounds = array<i64: 1>, scalar_prefetch = 0 : i64, scratch_operands = 0 : i64, tpu.core_type = #tpu.core_type<tc>, window_params = [{transform_indices = @transform_0, window_bounds = array<i64: 16, 40>}, {transform_indices = @transform_1, window_bounds = array<i64: 16, 24>}, {pipeline_mode = #tpu.pipeline_mode<synchronous>, transform_indices = @transform_2, window_bounds = array<i64: 40, 256>}, {pipeline_mode = #tpu.pipeline_mode<synchronous>, transform_indices = @transform_3, window_bounds = array<i64: 24, 256>}, {pipeline_mode = #tpu.pipeline_mode<synchronous>, transform_indices = @transform_4, window_bounds = array<i64: 1, 256>}, {transform_indices = @transform_5, window_bounds = array<i64: 16, 128>}]} {
    %c0 = arith.constant 0 : index
    %c0_0 = arith.constant 0 : index
    %0 = vector.load %arg1[%c0, %c0_0] : memref<16x40xf32, #tpu.memory_space<vmem>>, vector<16x40xf32>
    %c0_1 = arith.constant 0 : index
    %c0_2 = arith.constant 0 : index
    %1 = vector.load %arg3[%c0_1, %c0_2] : memref<40x256xf32, #tpu.memory_space<vmem>>, vector<40x256xf32>
    %cst = arith.constant dense<0.000000e+00> : vector<16x256xf32>
    %2 = tpu.matmul %0, %1, %cst {dimension_numbers = #tpu.dot_dimension_numbers<[1], [0], [0], [1], [0, 0, 1, 1], [], []>} : vector<16x40xf32>, vector<40x256xf32>, vector<16x256xf32> -> vector<16x256xf32>
    %c0_3 = arith.constant 0 : index
    %c0_4 = arith.constant 0 : index
    %3 = vector.load %arg2[%c0_3, %c0_4] : memref<16x24xf32, #tpu.memory_space<vmem>>, vector<16x24xf32>
    %c0_5 = arith.constant 0 : index
    %c0_6 = arith.constant 0 : index
    %4 = vector.load %arg4[%c0_5, %c0_6] : memref<24x256xf32, #tpu.memory_space<vmem>>, vector<24x256xf32>
    %cst_7 = arith.constant dense<0.000000e+00> : vector<16x256xf32>
    %5 = tpu.matmul %3, %4, %cst_7 {dimension_numbers = #tpu.dot_dimension_numbers<[1], [0], [0], [1], [0, 0, 1, 1], [], []>} : vector<16x24xf32>, vector<24x256xf32>, vector<16x256xf32> -> vector<16x256xf32>
    %6 = arith.addf %2, %5 : vector<16x256xf32>
    %c0_8 = arith.constant 0 : index
    %c0_9 = arith.constant 0 : index
    %7 = vector.load %arg5[%c0_8, %c0_9] : memref<1x256xf32, #tpu.memory_space<vmem>>, vector<1x256xf32>
    %8 = vector.broadcast %7 : vector<1x256xf32> to vector<16x256xf32>
    %9 = arith.addf %6, %8 : vector<16x256xf32>
    %10 = vector.extract_strided_slice %9 {offsets = [0, 0], sizes = [16, 128], strides = [1, 1]} : vector<16x256xf32> to vector<16x128xf32>
    %11 = vector.extract_strided_slice %9 {offsets = [0, 128], sizes = [16, 128], strides = [1, 1]} : vector<16x256xf32> to vector<16x128xf32>
    %cst_10 = arith.constant dense<0xFF800000> : vector<16xf32>
    %12 = vector.multi_reduction <maximumf>, %11, %cst_10 [1] : vector<16x128xf32> to vector<16xf32>
    %13 = vector.shape_cast %12 : vector<16xf32> to vector<16x1xf32>
    %14 = vector.broadcast %13 : vector<16x1xf32> to vector<16x128xf32>
    %15 = arith.subf %11, %14 : vector<16x128xf32>
    %16 = math.exp %15 : vector<16x128xf32>
    %cst_11 = arith.constant dense<0.000000e+00> : vector<16xf32>
    %17 = vector.multi_reduction <add>, %16, %cst_11 [1] : vector<16x128xf32> to vector<16xf32>
    %18 = vector.shape_cast %17 : vector<16xf32> to vector<16x1xf32>
    %19 = tpu.reciprocal %18 {approx = true} : vector<16x1xf32> -> vector<16x1xf32>
    %20 = vector.broadcast %19 : vector<16x1xf32> to vector<16x128xf32>
    %21 = arith.mulf %16, %20 : vector<16x128xf32>
    %22 = arith.mulf %21, %10 : vector<16x128xf32>
    %c0_12 = arith.constant 0 : index
    %c0_13 = arith.constant 0 : index
    %23 = vector.load %arg6[%c0_12, %c0_13] : memref<16x128xf32, #tpu.memory_space<vmem>>, vector<16x128xf32>
    tpu.vector_store %arg6[%c0_12, %c0_13], %22 {strides = array<i32>} : memref<16x128xf32, #tpu.memory_space<vmem>>, vector<16x128xf32>,
    return
  }
  func.func @transform_0(%arg0: i32) -> (i32, i32) {
    %c0_i32 = arith.constant 0 : i32
    %c0_i32_0 = arith.constant 0 : i32
    return %arg0, %c0_i32 : i32, i32
  }
  func.func @transform_1(%arg0: i32) -> (i32, i32) {
    %c0_i32 = arith.constant 0 : i32
    %c0_i32_0 = arith.constant 0 : i32
    return %arg0, %c0_i32 : i32, i32
  }
  func.func @transform_2(%arg0: i32) -> (i32, i32) {
    %c0_i32 = arith.constant 0 : i32
    %c0_i32_0 = arith.constant 0 : i32
    %c0_i32_1 = arith.constant 0 : i32
    return %c0_i32, %c0_i32_0 : i32, i32
  }
  func.func @transform_3(%arg0: i32) -> (i32, i32) {
    %c0_i32 = arith.constant 0 : i32
    %c0_i32_0 = arith.constant 0 : i32
    %c0_i32_1 = arith.constant 0 : i32
    return %c0_i32, %c0_i32_0 : i32, i32
  }
  func.func @transform_4(%arg0: i32) -> (i32, i32) {
    %c0_i32 = arith.constant 0 : i32
    %c0_i32_0 = arith.constant 0 : i32
    %c0_i32_1 = arith.constant 0 : i32
    return %c0_i32, %c0_i32_0 : i32, i32
  }
  func.func @transform_5(%arg0: i32) -> (i32, i32) {
    %c0_i32 = arith.constant 0 : i32
    %c0_i32_0 = arith.constant 0 : i32
    return %arg0, %c0_i32 : i32, i32
  }
}

</mosaic_0001>

<bundles_post_ra>
// kernel: tpu_custom_call.1
= control target key start
LH: loop header
LB: loop body
LE: loop exit
PB: predicated region body
PF: predicated region fallthrough
CT: control target
= control target key end

     0   :  { %10 = vsyncpa [#allocation3], 0  ;;  %s596_s0 = inlined_call_operand.hbm [shape: f32[16,40], index: 0, kind: input, shape index: {}]   ;;  %s597_s1 = inlined_call_operand.hbm [shape: f32[16,24], index: 1, kind: input, shape index: {}]   ;;  %s598_s2 = inlined_call_operand.hbm [shape: f32[40,256], index: 2, kind: input, shape index: {}]   ;;  %s599_s3 = inlined_call_operand.hbm [shape: f32[24,256], index: 3, kind: input, shape index: {}]   ;;  %s600_s4 = inlined_call_operand.vmem [shape: f32[1,256], index: 4, kind: input, shape index: {}]   ;;  %s601_s5 = inlined_call_operand.hbm [shape: f32[16,128], index: 5, kind: output, shape index: {}]  }
   0x1   :  { %11 = vsyncpa [#allocation6], 0 }
   0x2   :  { %12 = vsyncpa [#allocation9], 0 }
   0x3   :  { %13 = vsyncpa [#allocation4], 0  ;;  %s477_s18 = smov [#allocation5]   ;;  %s478_s20 = smov [#allocation2]  }
   0x4   :  { %s31_s19 = sshll.u32 %s477_s18, 4  ;;  %s19_s21 = sshll.u32 %s478_s20, 4  ;;  %s32_s19 = int_to_ptr.vmem [resolvable:$true] %s31_s19  ;;  %s517_s21 = int_to_ptr.vmem [resolvable:$true] %s19_s21 }
   0x5   :  { %s359_s24 = scalar_lea.hbm %s597_s1, 256 }
   0x6   :  { %p360_p0 = scmp.ne.s32.totalorder %s597_s1, %s359_s24  ;;  %p363_p1 = scmp.lt.u32.totalorder %s359_s24, %s597_s1 }
   0x8   :  { %p365_p2 = pnand %p363_p1, %p360_p0 }
   0xa   :  { %368 = shalt.err (!%p365_p2)
}
   0xb   :  { %s369_s29 = scalar_lea.vmem %s32_s19, 256  ;;  %p374_p4 = scmp.lt.s32.totalorder %s32_s19, %s32_s19 }
   0xc   :  { %p370_p3 = scmp.ne.s32.totalorder %s32_s19, %s369_s29  ;;  %p375_p5 = scmp.lt.s32.totalorder %s369_s29, %s369_s29 }
   0xe   :  { %p376_p6 = por %p375_p5, %p374_p4 }
  0x10   :  { %p377_p7 = pnand %p376_p6, %p370_p3 }
  0x12   :  { %380 = shalt.err (!%p377_p7)
}
  0x13   :  { %s479_s30 = smov 128   ;;  %s480_s6 = smov 8  }
  0x14   :  { %37 = dma.hbm_to_vmem [thread:$0]  %s597_s1, 256, %s32_s19, [#allocation6], %s479_s30, %s479_s30, %s480_s6  }
  0x15   :  { %s381_s11 = scalar_lea.hbm %s596_s0, 256 }
  0x16   :  { %p382_p8 = scmp.ne.s32.totalorder %s596_s0, %s381_s11  ;;  %p385_p9 = scmp.lt.u32.totalorder %s381_s11, %s596_s0 }
  0x18   :  { %p387_p10 = pnand %p385_p9, %p382_p8 }
  0x1a   :  { %390 = shalt.err (!%p387_p10)
}
  0x1b   :  { %s391_s16 = scalar_lea.vmem %s517_s21, 256  ;;  %p396_p12 = scmp.lt.s32.totalorder %s517_s21, %s517_s21 }
  0x1c   :  { %p392_p11 = scmp.ne.s32.totalorder %s517_s21, %s391_s16  ;;  %p397_p13 = scmp.lt.s32.totalorder %s391_s16, %s391_s16 }
  0x1e   :  { %p398_p0 = por %p397_p13, %p396_p12 }
  0x20   :  { %p399_p1 = pnand %p398_p0, %p392_p11 }
  0x22   :  { %402 = shalt.err (!%p399_p1)
}
  0x23   :  { %25 = dma.hbm_to_vmem [thread:$0]  %s596_s0, 256, %s517_s21, [#allocation3], %s479_s30, %s479_s30, %s480_s6  }
  0x24   :  { %s481_s18 = smov [#allocation7]   ;;  %s403_s23 = scalar_lea.hbm %s598_s2, 1280 }
  0x25   :  { %s43_s19 = sshll.u32 %s481_s18, 4  ;;  %p404_p2 = scmp.ne.s32.totalorder %s598_s2, %s403_s23  ;;  %s44_s19 = int_to_ptr.vmem [resolvable:$true] %s43_s19 }
  0x26   :  { %p407_p3 = scmp.lt.u32.totalorder %s403_s23, %s598_s2 }
  0x28   :  { %p409_p4 = pnand %p407_p3, %p404_p2 }
  0x2a   :  { %412 = shalt.err (!%p409_p4)
}
  0x2b   :  { %s413_s28 = scalar_lea.vmem %s44_s19, 1280  ;;  %p418_p6 = scmp.lt.s32.totalorder %s44_s19, %s44_s19 }
  0x2c   :  { %p414_p5 = scmp.ne.s32.totalorder %s44_s19, %s413_s28  ;;  %p419_p7 = scmp.lt.s32.totalorder %s413_s28, %s413_s28 }
  0x2e   :  { %p420_p8 = por %p419_p7, %p418_p6 }
  0x30   :  { %p421_p9 = pnand %p420_p8, %p414_p5 }
  0x32   :  { %424 = shalt.err (!%p421_p9)
}
  0x33   :  { %s482_s0 = smov 256   ;;  %s483_s21 = smov 16  }
  0x34   :  { %49 = dma.hbm_to_vmem [thread:$0]  %s598_s2, 1280, %s44_s19, [#allocation6], %s482_s0, %s482_s0, %s483_s21  }
  0x35   :  { %s484_s8 = smov [#allocation8]   ;;  %s425_s12 = scalar_lea.hbm %s599_s3, 768 }
  0x36   :  { %s55_s9 = sshll.u32 %s484_s8, 4  ;;  %p426_p10 = scmp.ne.s32.totalorder %s599_s3, %s425_s12  ;;  %s56_s9 = int_to_ptr.vmem [resolvable:$true] %s55_s9 }
  0x37   :  { %p429_p11 = scmp.lt.u32.totalorder %s425_s12, %s599_s3 }
  0x39   :  { %p431_p12 = pnand %p429_p11, %p426_p10 }
  0x3b   :  { %434 = shalt.err (!%p431_p12)
}
  0x3c   :  { %s435_s1 = scalar_lea.vmem %s56_s9, 768  ;;  %p440_p0 = scmp.lt.s32.totalorder %s56_s9, %s56_s9 }
  0x3d   :  { %p436_p13 = scmp.ne.s32.totalorder %s56_s9, %s435_s1  ;;  %p441_p1 = scmp.lt.s32.totalorder %s435_s1, %s435_s1 }
  0x3f   :  { %p442_p2 = por %p441_p1, %p440_p0 }
  0x41   :  { %p443_p3 = pnand %p442_p2, %p436_p13 }
  0x43   :  { %446 = shalt.err (!%p443_p3)
}
  0x44   :  { %61 = dma.hbm_to_vmem [thread:$0]  %s599_s3, 768, %s56_s9, [#allocation9], %s482_s0, %s482_s0, %s483_s21  }
  0x45   :  { %469 = dma.done.wait [#allocation3], 256  }
  0x46   :  { %470 = vsyncadd [#allocation3], 4294967040 }
  0x47   :  { %471 = dma.done.wait [#allocation6], 1536  }
  0x48   :  { %472 = vsyncadd [#allocation6], 4294965760 }
  0x49   :  { %473 = dma.done.wait [#allocation9], 768  }
  0x4a   :  { %474 = vsyncadd [#allocation9], 4294966528  ;;  %v485_v0 = vmov 0.0   ;;  %v79_v1 = vld [vmem:[#allocation7 + $0x8] sm:$0xff]  ;;  %v81_v2 = vld [vmem:[#allocation7 + $0x18] sm:$0xff]  ;;  %vm96_vm0 = vcmask 195584   ;;  %v266_v27 = vlaneseq }
  0x4b   :  { %167 = vmatprep.mubr.f32.mxu1 %v485_v0  ;;  %251 = vmatprep.mubr.f32.mxu0 %v485_v0  ;;  %v78_v3 = vld [vmem:[#allocation7] sm:$0xff]  ;;  %v329_v4 = vpack.c.bf16 %v81_v2, %v79_v1  ;;  %v80_v5 = vld [vmem:[#allocation7 + $0x10] sm:$0xff]  ;;  %v91_v6 = vld [vmem:[#allocation8 + $0x8] sm:$0xff]  ;;  %vm180_vm1 = vcmask 326656  }
  0x4c   :  { %v93_v7 = vld [vmem:[#allocation8 + $0x18] sm:$0xff]  ;;  %v331_v8 = vpack.c.bf16 %v80_v5, %v78_v3  ;;  %v90_v10 = vld [vmem:[#allocation8] sm:$0xff]  ;;  %v92_v11 = vld [vmem:[#allocation8 + $0x10] sm:$0xff]  ;;  %v267_v28 = vshrl.u32 %v266_v27, 7 }
  0x4d   :  { %v325_v9 = vpack.c.bf16 %v93_v7, %v91_v6  ;;  %v83_v12 = vld [vmem:[#allocation7 + $0x28] sm:$0xff]  ;;  %330 = vmatprep.subr.bf16.mxu0 %v329_v4  ;;  %v327_v13 = vpack.c.bf16 %v92_v11, %v90_v10  ;;  %v85_v14 = vld [vmem:[#allocation7 + $0x38] sm:$0xff]  ;;  %v82_v15 = vld [vmem:[#allocation7 + $0x20] sm:$0xff] }
  0x4e   :  { %v84_v16 = vld [vmem:[#allocation7 + $0x30] sm:$0xff]  ;;  %332 = vmatpush1.bf16.msra.mxu0 %v331_v8  ;;  %v333_v17 = vpack.c.bf16 %v85_v14, %v83_v12  ;;  %v95_v19 = vld [vmem:[#allocation8 + $0x28] sm:$0xff]  ;;  %v87_v21 = vld [vmem:[#allocation7 + $0x48] sm:$0xff]  ;;  %v268_v29 = vsub.s32 0, %v267_v28  ;;  %v272_v32 = vsub.s32 1, %v267_v28 }
  0x4f   :  { %326 = vmatprep.subr.bf16.mxu1 %v325_v9  ;;  %v335_v18 = vpack.c.bf16 %v84_v16, %v82_v15  ;;  %v94_v20 = vld [vmem:[#allocation8 + $0x20] sm:$0xff]  ;;  %v86_v23 = vld [vmem:[#allocation7 + $0x40] sm:$0xff]  ;;  %v89_v25 = vld [vmem:[#allocation5 + $0x8] sm:$0xff] }
  0x50   :  { %328 = vmatpush1.bf16.msra.mxu1 %v327_v13  ;;  %334 = vmatprep.subr.bf16.mxu0 %v333_v17  ;;  %v88_v22 = vld [vmem:[#allocation5] sm:$0xff]  ;;  %v76_v24 = vld [vmem:[#allocation2] sm:$0xff]  ;;  %v77_v26 = vld [vmem:[#allocation2 + $0x8] sm:$0xff] }
  0x51   :  { %107 = vmatprep.subr.mxu1 %v95_v19  ;;  %v264_v30 = vld [vmem:[%s600_s4] sm:$0x3]  ;;  %s486_s4 = smov [#allocation10]  }
  0x52   :  { %336 = vmatpush1.bf16.msra.mxu0 %v335_v18  ;;  %v269_v31 = vrot.slane %v264_v30, %v268_v29  ;;  %v273_v36 = vrot.slane %v264_v30, %v272_v32  ;;  %s307_s19 = sshll.u32 %s486_s4, 4  ;;  %s308_s19 = int_to_ptr.vmem [resolvable:$true] %s307_s19 }
  0x53   :  { %195 = vmatprep.subr.mxu0 %v87_v21  ;;  %s447_s20 = scalar_lea.vmem %s308_s19, 256  ;;  %p452_p5 = scmp.lt.s32.totalorder %s308_s19, %s308_s19 }
  0x54   :  { %108 = vmatpush1.msra.mxu1 %v94_v20  ;;  %p448_p4 = scmp.ne.s32.totalorder %s308_s19, %s447_s20  ;;  %p453_p6 = scmp.lt.s32.totalorder %s447_s20, %s447_s20 }
  0x55   :  { %321 = vmatmul.mubr.msk.f32.vlgmr.msra.gmra.mrb[0].mxu1 %vm96_vm0, %v88_v22 }
  0x56   :  { %173 = vmatprep.mubr.f32.mxu1 %v485_v0  ;;  %196 = vmatpush1.msra.mxu0 %v86_v23  ;;  %p454_p7 = por %p453_p6, %p452_p5 }
  0x57   :  { %323 = vmatmul.mubr.msk.f32.vlgmr.msra.gmra.mrb[0].mxu0 %vm180_vm1, %v76_v24 }
  0x58   :  { %257 = vmatprep.mubr.f32.mxu0 %v485_v0  ;;  %p455_p8 = pnand %p454_p7, %p448_p4 }
  0x59   :  { %322 = vmatmul.mubr.msk.f32.gmra.mrb[2].mxu1 %vm96_vm0, %v89_v25 }
  0x5b   :  { %324 = vmatmul.mubr.msk.f32.gmra.mrb[2].mxu0 %vm180_vm1, %v77_v26 }
 0x128   :  { %v169_v33 = vpop.f32.mrb[0].mxu1 }
 0x129   :  { %v171_v34 = vpop.f32.mrb[1].mxu1 }
 0x12a   :  { %v253_v35 = vpop.f32.mrb[0].mxu0 }
 0x12b   :  { %v254_v37 = vadd.f32 %v253_v35, %v169_v33  ;;  %v255_v38 = vpop.f32.mrb[1].mxu0 }
 0x12c   :  { %v175_v39 = vpop.f32.mrb[2].mxu1  ;;  %v256_v40 = vadd.f32 %v255_v38, %v171_v34 }
 0x12d   :  { %v177_v41 = vpop.f32.mrb[3].mxu1  ;;  %v276_v42 = vadd.f32 %v269_v31, %v254_v37 }
 0x12e   :  { %v259_v43 = vpop.f32.mrb[2].mxu0  ;;  %v277_v44 = vadd.f32 %v273_v36, %v256_v40 }
 0x12f   :  { %v260_v45 = vadd.f32 %v259_v43, %v175_v39  ;;  %v261_v46 = vpop.f32.mrb[3].mxu0 }
 0x130   :  { %v262_v47 = vadd.f32 %v261_v46, %v177_v41  ;;  %280 = vmax.xlane.f32.xlu0 %v277_v44 }
 0x131   :  { %v278_v48 = vadd.f32 %v269_v31, %v260_v45 }
 0x132   :  { %v279_v49 = vadd.f32 %v273_v36, %v262_v47 }
 0x134   :  { %282 = vmax.xlane.f32.xlu0 %v279_v49 }
 0x1bd   :  { %v281_v50 = vpop.xlane.xlu0 %280 }
 0x1be   :  { %v284_v51 = vsub.f32 %v277_v44, %v281_v50 }
 0x1c0   :  { %v286_v52 = vmul.f32 1.442695, %v284_v51 }
 0x1c1   :  { %v283_v53 = vpop.xlane.xlu0 %282 }
 0x1c2   :  { %351 = vpow2.f32 %v286_v52  ;;  %v285_v54 = vsub.f32 %v279_v49, %v283_v53 }
 0x1c4   :  { %v288_v55 = vmul.f32 1.442695, %v285_v54 }
 0x1c6   :  { %353 = vpow2.f32 %v288_v55 }
 0x1cc   :  { %v352_v56 = vpop.eup %351 }
 0x1cd   :  { %290 = vadd.xlane.f32.xlu1 %v352_v56 }
 0x1d0   :  { %v354_v57 = vpop.eup %353 }
 0x1d1   :  { %292 = vadd.xlane.f32.xlu1 %v354_v57 }
 0x25a   :  { %v291_v58 = vpop.xlane.xlu1 %290 }
 0x25b   :  { %355 = vrcp.f32 %v291_v58 }
 0x25e   :  { %v293_v59 = vpop.xlane.xlu1 %292 }
 0x25f   :  { %357 = vrcp.f32 %v293_v59 }
 0x265   :  { %v356_v60 = vpop.eup %355 }
 0x266   :  { %v296_v61 = vmul.f32 %v356_v60, %v352_v56 }
 0x268   :  { %v298_v62 = vmul.f32 %v296_v61, %v276_v42 }
 0x269   :  { %v358_v63 = vpop.eup %357 }
 0x26a   :  { %v297_v0 = vmul.f32 %v358_v63, %v354_v57  ;;  %300 = vst [vmem:[#allocation10] sm:$0xff] %v298_v62 }
 0x26c   :  { %v299_v1 = vmul.f32 %v297_v0, %v278_v48 }
 0x26e   :  { %301 = vst [vmem:[#allocation10 + $0x8] sm:$0xff] %v299_v1 }
 0x26f   :  { %458 = shalt.err (!%p455_p8)
}
 0x270   :  { %s459_s24 = scalar_lea.hbm %s601_s5, 256 }
 0x271   :  { %p460_p9 = scmp.ne.s32.totalorder %s601_s5, %s459_s24  ;;  %p463_p10 = scmp.lt.u32.totalorder %s459_s24, %s601_s5 }
 0x273   :  { %p465_p11 = pnand %p463_p10, %p460_p9 }
 0x275   :  { %468 = shalt.err (!%p465_p11)
}
 0x276   :  { %313 = dma.vmem_to_hbm [thread:$0]  %s308_s19, 256, %s601_s5, [#allocation4], %s479_s30, %s479_s30, %s480_s6  }
 0x277   :  { %475 = dma.done.wait [#allocation4], 256  }
 0x278   :  { %476 = vsyncadd [#allocation4], 4294967040 }
 0x279   :  { %317 = vsyncpa [#allocation3], 1 }
 0x27a   :  { %318 = vsyncpa [#allocation6], 1 }
 0x27b   :  { %319 = vsyncpa [#allocation9], 1 }
 0x27c   :  { %320 = vsyncpa [#allocation4], 1 }

</bundles_post_ra>
